<compile_context>
chip_gen: v7x
topology: tpu7x:2x2x1
jax: 0.10.0
libtpu: 0.0.40
codegen_flags: <defaults>
</compile_context>

<pallas_src>
import jax
import jax.numpy as jnp
from jax.experimental import pallas as pl
from jax.experimental.pallas import tpu as pltpu


def simple_rnn_kernel(x_ref, wh_ref, wfc_ref, out_ref, xw_ref, h_ref):
    """One (batch-chunk, time-chunk) grid step.

    x_ref  : (tT, tB, I)      time-major input chunk
    wh_ref : (I + H + 1, H)   packed [W_ih; W_hh; b_ih + b_hh]
    wfc_ref: (H + 1, O)       packed [W_fc; b_fc]
    out_ref: (tB, O)          fc(last hidden), written only at the last chunk
    xw_ref : (tT, tB, H)      VMEM scratch for the hoisted input projection
    h_ref  : (tB, H)          VMEM scratch carrying h across time chunks
    """
    tT, tB, I = x_ref.shape
    H = h_ref.shape[1]
    t_idx = pl.program_id(1)

    # Start of a fresh batch chunk's sequence: zero the carried hidden state.
    @pl.when(t_idx == 0)
    def _init():
        h_ref[...] = jnp.zeros_like(h_ref)

    # Static slices of the packed parameter arrays (zero runtime cost).
    wih = wh_ref[0:I, :]                    # (I, H)
    whh = wh_ref[I:I + H, :]                # (H, H)
    b_rnn = wh_ref[I + H:I + H + 1, :]      # (1, H)  = b_ih + b_hh

    # Prologue (off the serial critical path): project the whole chunk with
    # one MXU matmul and fold in the pre-summed bias.
    xw = jnp.dot(x_ref[...].reshape(tT * tB, I), wih,
                 preferred_element_type=jnp.float32) + b_rnn
    xw_ref[...] = xw.reshape(tT, tB, H)

    # Serial recurrence over the time steps inside this chunk.
    def step(t, h):
        pre = xw_ref[t] + jnp.dot(h, whh, preferred_element_type=jnp.float32)
        return jnp.tanh(pre)

    h_ref[...] = jax.lax.fori_loop(0, tT, step, h_ref[...],
                                   unroll=min(tT, 8))

    # Epilogue: final Linear on the last hidden state only, once per batch
    # chunk (output block stays resident across the time axis).
    @pl.when(t_idx == pl.num_programs(1) - 1)
    def _fc():
        wfc = wfc_ref[0:H, :]               # (H, O)
        bfc = wfc_ref[H:H + 1, :]           # (1, O)
        out_ref[...] = (jnp.dot(h_ref[...], wfc,
                                preferred_element_type=jnp.float32)
                        + bfc).astype(out_ref.dtype)


def simple_rnn_forward(x, params, *, tile_t=None, tile_b=None):
    """x: (B, T, I) float32 (batch_first). Returns (B, O) = fc(last hidden)."""
    wih, whh, bih, bhh, wfc, bfc = params
    B, T, I = x.shape
    H = whh.shape[0]
    O = wfc.shape[1]

    tile_b = B if tile_b is None else tile_b
    tile_t = min(T, 128) if tile_t is None else tile_t
    assert B % tile_b == 0 and T % tile_t == 0, "tiles must divide B and T"
    assert tile_b == B or tile_b % 8 == 0, "batch tile must be 8-aligned"

    # Time-major so one rectangular block covers a (time-chunk, batch-chunk).
    # TODO(synk): fuse this transpose into the upstream producer at production
    # sizes to avoid the extra HBM pass over x.
    x_tm = jnp.transpose(x, (1, 0, 2))                        # (T, B, I)

    # Pack the six tiny parameter tensors into two arrays (2 DMAs, not 6).
    b_rnn = (bih + bhh).reshape(1, H)
    wh_pack = jnp.concatenate([wih, whh, b_rnn], axis=0)       # (I+H+1, H)
    wfc_pack = jnp.concatenate([wfc, bfc.reshape(1, O)], axis=0)  # (H+1, O)

    grid = (B // tile_b, T // tile_t)

    grid_spec = pltpu.PrefetchScalarGridSpec(
        num_scalar_prefetch=0,
        grid=grid,
        in_specs=[
            # Time-chunked, batch-chunked input (pipelined by Pallas).
            pl.BlockSpec((tile_t, tile_b, I), lambda b, t: (t, b, 0)),
            # Packed RNN parameters (grid-invariant).
            pl.BlockSpec((I + H + 1, H), lambda b, t: (0, 0)),
            # Packed FC parameters (grid-invariant).
            pl.BlockSpec((H + 1, O), lambda b, t: (0, 0)),
        ],
        # Output block resident across the time axis; written at the last chunk.
        out_specs=pl.BlockSpec((tile_b, O), lambda b, t: (b, 0)),
        scratch_shapes=[
            pltpu.VMEM((tile_t, tile_b, H), jnp.float32),   # hoisted projection
            pltpu.VMEM((tile_b, H), jnp.float32),           # carried hidden h
        ],
    )

    return pl.pallas_call(
        simple_rnn_kernel,
        out_shape=jax.ShapeDtypeStruct((B, O), jnp.float32),
        grid_spec=grid_spec,
        compiler_params=pltpu.CompilerParams(
            # Batch chunks are independent -> shard across TCs on v7x;
            # the time recurrence is strictly sequential.
            dimension_semantics=("parallel", "arbitrary"),
            vmem_limit_bytes=32 * 1024 * 1024,
        ),
    )(x_tm, wh_pack, wfc_pack)


def reference_forward(x, params):
    """Pure-JAX reference mirroring PyTorch nn.RNN + nn.Linear semantics."""
    wih, whh, bih, bhh, wfc, bfc = params
    B = x.shape[0]
    H = whh.shape[0]
    h0 = jnp.zeros((B, H), jnp.float32)

    def step(h, x_t):
        h_new = jnp.tanh(x_t @ wih + h @ whh + bih + bhh)
        return h_new, None

    h_last, _ = jax.lax.scan(step, h0, jnp.transpose(x, (1, 0, 2)))
    return h_last @ wfc + bfc


def init_params(key, input_size, hidden_size, output_size):
    # PyTorch-style uniform(-1/sqrt(H), 1/sqrt(H)) init, deterministic.
    ks = jax.random.split(key, 6)
    bound = 1.0 / jnp.sqrt(hidden_size)
    wih = jax.random.uniform(ks[0], (input_size, hidden_size), jnp.float32,
                             -bound, bound)
    whh = jax.random.uniform(ks[1], (hidden_size, hidden_size), jnp.float32,
                             -bound, bound)
    bih = jax.random.uniform(ks[2], (hidden_size,), jnp.float32, -bound, bound)
    bhh = jax.random.uniform(ks[3], (hidden_size,), jnp.float32, -bound, bound)
    wfc = jax.random.uniform(ks[4], (hidden_size, output_size), jnp.float32,
                             -bound, bound)
    bfc = jax.random.uniform(ks[5], (output_size,), jnp.float32, -bound, bound)
    return (wih, whh, bih, bhh, wfc, bfc)


if __name__ == "__main__":
    # Small shapes consistent with the module's forward:
    # batch=8, seq=8, input_size=16, hidden_size=32, output_size=8
    B, T, I, H, O = 8, 8, 16, 32, 8

    key = jax.random.PRNGKey(0)
    kx, kp = jax.random.split(key)
    x = jax.random.normal(kx, (B, T, I), jnp.float32)
    params = init_params(kp, I, H, O)

    # tile_t=4 -> 2 time chunks, exercising the carried-h chunked pipeline.
    out = simple_rnn_forward(x, params, tile_t=4)
    out = jax.block_until_ready(out)

    ref = reference_forward(x, params)
    assert out.shape == (B, O)
    assert jnp.allclose(out, ref, atol=1e-5, rtol=1e-5), \
        f"mismatch: max abs err {jnp.max(jnp.abs(out - ref))}"

    print("KERNEL_OK")
</pallas_src>

<mosaic_0001>
module attributes {stable_mosaic.version = 11 : i64} {
  func.func @simple_rnn_kernel(%arg0: i32, %arg1: i32, %arg2: memref<4x8x16xf32, #tpu.memory_space<vmem>>, %arg3: memref<49x32xf32, #tpu.memory_space<vmem>>, %arg4: memref<33x8xf32, #tpu.memory_space<vmem>>, %arg5: memref<8x8xf32, #tpu.memory_space<vmem>>, %arg6: memref<4x8x32xf32, #tpu.memory_space<vmem>>, %arg7: memref<8x32xf32, #tpu.memory_space<vmem>>) attributes {dimension_semantics = [#tpu.dimension_semantics<parallel>, #tpu.dimension_semantics<arbitrary>], iteration_bounds = array<i64: 1, 2>, scalar_prefetch = 0 : i64, scratch_operands = 2 : i64, tpu.core_type = #tpu.core_type<tc>, window_params = [{transform_indices = @transform_0, window_bounds = array<i64: 4, 8, 16>}, {pipeline_mode = #tpu.pipeline_mode<synchronous>, transform_indices = @transform_1, window_bounds = array<i64: 49, 32>}, {pipeline_mode = #tpu.pipeline_mode<synchronous>, transform_indices = @transform_2, window_bounds = array<i64: 33, 8>}, {transform_indices = @transform_3, window_bounds = array<i64: 8, 8>}]} {
    %c0_i32 = arith.constant 0 : i32
    %0 = arith.cmpi eq, %arg1, %c0_i32 : i32
    %1 = arith.extui %0 : i1 to i32
    %c0_i32_0 = arith.constant 0 : i32
    %2 = arith.cmpi ne, %1, %c0_i32_0 : i32
    scf.if %2 {
      %cst_29 = arith.constant 0.000000e+00 : f32
      %42 = vector.broadcast %cst_29 : f32 to vector<8x32xf32>
      %c0_30 = arith.constant 0 : index
      %c0_31 = arith.constant 0 : index
      %43 = vector.load %arg7[%c0_30, %c0_31] : memref<8x32xf32, #tpu.memory_space<vmem>>, vector<8x32xf32>
      tpu.vector_store %arg7[%c0_30, %c0_31], %42 {strides = array<i32>} : memref<8x32xf32, #tpu.memory_space<vmem>>, vector<8x32xf32>,
    } else {
    }
    %c0 = arith.constant 0 : index
    %c0_1 = arith.constant 0 : index
    %3 = vector.load %arg3[%c0, %c0_1] : memref<49x32xf32, #tpu.memory_space<vmem>>, vector<16x32xf32>
    %c16 = arith.constant 16 : index
    %c0_2 = arith.constant 0 : index
    %4 = vector.load %arg3[%c16, %c0_2] : memref<49x32xf32, #tpu.memory_space<vmem>>, vector<32x32xf32>
    %c48 = arith.constant 48 : index
    %c0_3 = arith.constant 0 : index
    %5 = vector.load %arg3[%c48, %c0_3] : memref<49x32xf32, #tpu.memory_space<vmem>>, vector<1x32xf32>
    %c0_4 = arith.constant 0 : index
    %c0_5 = arith.constant 0 : index
    %c0_6 = arith.constant 0 : index
    %6 = vector.load %arg2[%c0_4, %c0_5, %c0_6] : memref<4x8x16xf32, #tpu.memory_space<vmem>>, vector<4x8x16xf32>
    %7 = vector.shape_cast %6 : vector<4x8x16xf32> to vector<32x16xf32>
    %cst = arith.constant dense<0.000000e+00> : vector<32x32xf32>
    %8 = tpu.matmul %7, %3, %cst {dimension_numbers = #tpu.dot_dimension_numbers<[1], [0], [0], [1], [0, 0, 1, 1], [], []>} : vector<32x16xf32>, vector<16x32xf32>, vector<32x32xf32> -> vector<32x32xf32>
    %9 = vector.broadcast %5 : vector<1x32xf32> to vector<32x32xf32>
    %10 = arith.addf %8, %9 : vector<32x32xf32>
    %11 = vector.shape_cast %10 : vector<32x32xf32> to vector<4x8x32xf32>
    %c0_7 = arith.constant 0 : index
    %c0_8 = arith.constant 0 : index
    %c0_9 = arith.constant 0 : index
    %12 = vector.load %arg6[%c0_7, %c0_8, %c0_9] : memref<4x8x32xf32, #tpu.memory_space<vmem>>, vector<4x8x32xf32>
    tpu.vector_store %arg6[%c0_7, %c0_8, %c0_9], %11 {strides = array<i32>} : memref<4x8x32xf32, #tpu.memory_space<vmem>>, vector<4x8x32xf32>,
    %c0_10 = arith.constant 0 : index
    %c0_11 = arith.constant 0 : index
    %13 = vector.load %arg7[%c0_10, %c0_11] : memref<8x32xf32, #tpu.memory_space<vmem>>, vector<8x32xf32>
    %c0_i32_12 = arith.constant 0 : i32
    %14 = arith.index_cast %c0_i32_12 : i32 to index
    %c0_13 = arith.constant 0 : index
    %c0_14 = arith.constant 0 : index
    %15 = vector.load %arg6[%14, %c0_13, %c0_14] : memref<4x8x32xf32, #tpu.memory_space<vmem>>, vector<1x8x32xf32>
    %16 = vector.shape_cast %15 : vector<1x8x32xf32> to vector<8x32xf32>
    %cst_15 = arith.constant dense<0.000000e+00> : vector<8x32xf32>
    %17 = tpu.matmul %13, %4, %cst_15 {dimension_numbers = #tpu.dot_dimension_numbers<[1], [0], [0], [1], [0, 0, 1, 1], [], []>} : vector<8x32xf32>, vector<32x32xf32>, vector<8x32xf32> -> vector<8x32xf32>
    %18 = arith.addf %16, %17 : vector<8x32xf32>
    %19 = math.tanh %18 : vector<8x32xf32>
    %c1_i32 = arith.constant 1 : i32
    %20 = arith.index_cast %c1_i32 : i32 to index
    %c0_16 = arith.constant 0 : index
    %c0_17 = arith.constant 0 : index
    %21 = vector.load %arg6[%20, %c0_16, %c0_17] : memref<4x8x32xf32, #tpu.memory_space<vmem>>, vector<1x8x32xf32>
    %22 = vector.shape_cast %21 : vector<1x8x32xf32> to vector<8x32xf32>
    %cst_18 = arith.constant dense<0.000000e+00> : vector<8x32xf32>
    %23 = tpu.matmul %19, %4, %cst_18 {dimension_numbers = #tpu.dot_dimension_numbers<[1], [0], [0], [1], [0, 0, 1, 1], [], []>} : vector<8x32xf32>, vector<32x32xf32>, vector<8x32xf32> -> vector<8x32xf32>
    %24 = arith.addf %22, %23 : vector<8x32xf32>
    %25 = math.tanh %24 : vector<8x32xf32>
    %c2_i32 = arith.constant 2 : i32
    %26 = arith.index_cast %c2_i32 : i32 to index
    %c0_19 = arith.constant 0 : index
    %c0_20 = arith.constant 0 : index
    %27 = vector.load %arg6[%26, %c0_19, %c0_20] : memref<4x8x32xf32, #tpu.memory_space<vmem>>, vector<1x8x32xf32>
    %28 = vector.shape_cast %27 : vector<1x8x32xf32> to vector<8x32xf32>
    %cst_21 = arith.constant dense<0.000000e+00> : vector<8x32xf32>
    %29 = tpu.matmul %25, %4, %cst_21 {dimension_numbers = #tpu.dot_dimension_numbers<[1], [0], [0], [1], [0, 0, 1, 1], [], []>} : vector<8x32xf32>, vector<32x32xf32>, vector<8x32xf32> -> vector<8x32xf32>
    %30 = arith.addf %28, %29 : vector<8x32xf32>
    %31 = math.tanh %30 : vector<8x32xf32>
    %c3_i32 = arith.constant 3 : i32
    %32 = arith.index_cast %c3_i32 : i32 to index
    %c0_22 = arith.constant 0 : index
    %c0_23 = arith.constant 0 : index
    %33 = vector.load %arg6[%32, %c0_22, %c0_23] : memref<4x8x32xf32, #tpu.memory_space<vmem>>, vector<1x8x32xf32>
    %34 = vector.shape_cast %33 : vector<1x8x32xf32> to vector<8x32xf32>
    %cst_24 = arith.constant dense<0.000000e+00> : vector<8x32xf32>
    %35 = tpu.matmul %31, %4, %cst_24 {dimension_numbers = #tpu.dot_dimension_numbers<[1], [0], [0], [1], [0, 0, 1, 1], [], []>} : vector<8x32xf32>, vector<32x32xf32>, vector<8x32xf32> -> vector<8x32xf32>
    %36 = arith.addf %34, %35 : vector<8x32xf32>
    %37 = math.tanh %36 : vector<8x32xf32>
    %c4_i32 = arith.constant 4 : i32
    %c0_25 = arith.constant 0 : index
    %c0_26 = arith.constant 0 : index
    %38 = vector.load %arg7[%c0_25, %c0_26] : memref<8x32xf32, #tpu.memory_space<vmem>>, vector<8x32xf32>
    tpu.vector_store %arg7[%c0_25, %c0_26], %37 {strides = array<i32>} : memref<8x32xf32, #tpu.memory_space<vmem>>, vector<8x32xf32>,
    %c1_i32_27 = arith.constant 1 : i32
    %39 = arith.cmpi eq, %arg1, %c1_i32_27 : i32
    %40 = arith.extui %39 : i1 to i32
    %c0_i32_28 = arith.constant 0 : i32
    %41 = arith.cmpi ne, %40, %c0_i32_28 : i32
    scf.if %41 {
      %c0_29 = arith.constant 0 : index
      %c0_30 = arith.constant 0 : index
      %42 = vector.load %arg4[%c0_29, %c0_30] : memref<33x8xf32, #tpu.memory_space<vmem>>, vector<32x8xf32>
      %c32 = arith.constant 32 : index
      %c0_31 = arith.constant 0 : index
      %43 = vector.load %arg4[%c32, %c0_31] : memref<33x8xf32, #tpu.memory_space<vmem>>, vector<1x8xf32>
      %c0_32 = arith.constant 0 : index
      %c0_33 = arith.constant 0 : index
      %44 = vector.load %arg7[%c0_32, %c0_33] : memref<8x32xf32, #tpu.memory_space<vmem>>, vector<8x32xf32>
      %cst_34 = arith.constant dense<0.000000e+00> : vector<8x8xf32>
      %45 = tpu.matmul %44, %42, %cst_34 {dimension_numbers = #tpu.dot_dimension_numbers<[1], [0], [0], [1], [0, 0, 1, 1], [], []>} : vector<8x32xf32>, vector<32x8xf32>, vector<8x8xf32> -> vector<8x8xf32>
      %46 = vector.broadcast %43 : vector<1x8xf32> to vector<8x8xf32>
      %47 = arith.addf %45, %46 : vector<8x8xf32>
      %c0_35 = arith.constant 0 : index
      %c0_36 = arith.constant 0 : index
      %48 = vector.load %arg5[%c0_35, %c0_36] : memref<8x8xf32, #tpu.memory_space<vmem>>, vector<8x8xf32>
      tpu.vector_store %arg5[%c0_35, %c0_36], %47 {strides = array<i32>} : memref<8x8xf32, #tpu.memory_space<vmem>>, vector<8x8xf32>,
    } else {
    }
    return
  }
  func.func @transform_0(%arg0: i32, %arg1: i32) -> (i32, i32, i32) {
    %c0_i32 = arith.constant 0 : i32
    %c0_i32_0 = arith.constant 0 : i32
    return %arg1, %arg0, %c0_i32 : i32, i32, i32
  }
  func.func @transform_1(%arg0: i32, %arg1: i32) -> (i32, i32) {
    %c0_i32 = arith.constant 0 : i32
    %c0_i32_0 = arith.constant 0 : i32
    %c0_i32_1 = arith.constant 0 : i32
    return %c0_i32, %c0_i32_0 : i32, i32
  }
  func.func @transform_2(%arg0: i32, %arg1: i32) -> (i32, i32) {
    %c0_i32 = arith.constant 0 : i32
    %c0_i32_0 = arith.constant 0 : i32
    %c0_i32_1 = arith.constant 0 : i32
    return %c0_i32, %c0_i32_0 : i32, i32
  }
  func.func @transform_3(%arg0: i32, %arg1: i32) -> (i32, i32) {
    %c0_i32 = arith.constant 0 : i32
    %c0_i32_0 = arith.constant 0 : i32
    return %arg0, %c0_i32 : i32, i32
  }
}

</mosaic_0001>

<bundles_post_ra>
// kernel: tpu_custom_call.1
= control target key start
LH: loop header
LB: loop body
LE: loop exit
PB: predicated region body
PF: predicated region fallthrough
CT: control target
= control target key end

     0   :  { %8 = vsyncpa [#allocation5], 0  ;;  %s1052_s12 = smov 0   ;;  %s1054_s13 = smov 0   ;;  %s1176_s0 = inlined_call_operand.vmem [shape: f32[8,8,16], index: 0, kind: input, shape index: {}]   ;;  %s1177_s1 = inlined_call_operand.vmem [shape: f32[49,32], index: 1, kind: input, shape index: {}]   ;;  %s1178_s2 = inlined_call_operand.vmem [shape: f32[33,8], index: 2, kind: input, shape index: {}]   ;;  %s1179_s3 = inlined_call_operand.hbm [shape: f32[8,8], index: 3, kind: output, shape index: {}]  }
   0x1   :  { %s1056_s14 = smov 0  }
   0x2 LB: > { %s771_s15 = sadd.s32 4294967295, %s1022_s14   ;;  %s23_s16 = sadd.s32 1, %s1018_s13  ;;  %s1022_s14 = sphi %s1056_s14, %s14_s14   ;;  %s1018_s13 = sphi %s1054_s13, %s1182_s13   ;;  %s1014_s12 = sphi %s1052_s12, %s1181_s12  }
   0x3   : > { %p24_p0 = scmp.ge.s32.totalorder %s23_s16, 2  ;;  %p774_p1 = scmp.ge.s32.totalorder %s1022_s14, 1 }
   0x4   : > { %p156_p2 = scmp.lt.s32.totalorder %s1022_s14, 3 }
   0x5   : > { %s1184_s16 = smov (%p24_p0, %s23_s16), 0 }
   0x6   : > { %p157_p3 = pnand %p774_p1, %p156_p2 }
   0x7   : > { %s775_s17 = sshll.u32 (!%p157_p3), %s1014_s12, 2  ;;  %p777_p5 = scmp.ne.s32.totalorder (!%p157_p3), %s1014_s12, 0 }
   0x8   : > { %160 = sbr.rel (%p157_p3) target bundleno = 1188 (0x4a4), region = 32  ;;  %p179_p4 = scmp.lt.s32.totalorder (!%p157_p3), %s775_s17, 7 }
   0xf   : > { %s1186_s17 = smov (!%p179_p4, %s775_s17), 7  ;;  %190 = sbr.rel (%p777_p5) target bundleno = 22 (0x16), region = 36 }
  0x10   : > { %s776_s18 = sshll.u32 %s1186_s17, 3  ;;  %vm191_vm0 = vcmask (!%p777_p5), 261120   ;;  %v1024_v0 = vmov (!%p777_p5), 0.0  }
  0x11   : > { %s1077_s21 = scalar_lea.vmem %s1176_s0, %s776_s18  ;;  %192 = vst.msk [vmem:[#allocation3] sm:$0xff] (!%p777_p5), %vm191_vm0, %v1024_v0 }
  0x16 PF: > { %v193_v1 = vld [vmem:[%s1177_s1] sm:$0xff]  ;;  %v194_v2 = vld [vmem:[%s1177_s1 + $0x8] sm:$0xff]  ;;  %vm208_vm1 = vcmask 130048   ;;  %v1025_v5 = vmov 0.0|0.0   ;;  %v195_v6 = vld [vmem:[%s1177_s1 + $0x10] sm:$0xff]  ;;  %vm1026_vm2 = vmmov 0  }
  0x17   : > { %v200_v3 = vld [vmem:[%s1077_s21] sm:$0xff]  ;;  %v890_v4 = vpack.c.bf16 %v194_v2, %v193_v1  ;;  %894 = vmatprep.subr.bf16.mxu1 %v1025_v5  ;;  %v196_v7 = vld [vmem:[%s1177_s1 + $0x18] sm:$0xff]  ;;  %v198_v10 = vld [vmem:[%s1177_s1 + $0x28] sm:$0xff]  ;;  %v1027_v11 = vmov 0.0   ;;  %vm306_vm3 = vcmask 261120   ;;  %p787_p6 = scmp.ne.s32.totalorder %s1014_s12, 1 }
  0x18   : > { %829 = vmatprep.mubr.msk.f32.mxu0 %vm208_vm1, %v200_v3  ;;  %v895_v8 = vpack.c.bf16 %v196_v7, %v195_v6  ;;  %v197_v9 = vld [vmem:[%s1177_s1 + $0x20] sm:$0xff]  ;;  %843 = vmatprep.mubr.msk.f32.mxu1 %vm1026_vm2, %v1027_v11  ;;  %v201_v12 = vld [vmem:[%s1077_s21 + $0x8] sm:$0xff]  ;;  %v202_v15 = vld [vmem:[%s1077_s21 + $0x10] sm:$0xff]  ;;  %v1028_v49 = vmov (!%p787_p6), 0.0|0.0   ;;  %vm1029_vm4 = vmmov (!%p787_p6), 0   ;;  %v1030_v52 = vmov (!%p787_p6), 0.0  }
  0x19   : > { %891 = vmatprep.subr.bf16.mxu0 %v890_v4  ;;  %v898_v13 = vpack.c.bf16 %v198_v10, %v197_v9  ;;  %v311_v14 = vld [vmem:[#allocation3] sm:$0xff]  ;;  %v203_v16 = vld [vmem:[%s1077_s21 + $0x18] sm:$0xff]  ;;  %v778_v17 = vld [vmem:[%s1177_s1 + $0x30] ss:$0 sm:$0xff]  ;;  %vm707_vm5 = vcmask (!%p787_p6), 64512  }
  0x1a   : > { %893 = vmatpush3.bf16.msra.mxu0 %v890_v4  ;;  %896 = vmatpush3.bf16.msra.mxu1 %v895_v8  ;;  %v624_v46 = vld [vmem:[%s1178_s2] sm:$0xff] (!%p787_p6)  ;;  %v625_v47 = vld [vmem:[%s1178_s2 + $0x8] sm:$0xff] (!%p787_p6)  ;;  %v626_v48 = vld [vmem:[%s1178_s2 + $0x10] sm:$0xff] (!%p787_p6) }
  0x1b   : > { %897 = vmatprep.subr.bf16.mxu1 %v1025_v5  ;;  %900 = vmatprep.subr.bf16.mxu0 %v1025_v5  ;;  %v919_v50 = vpack.c.bf16 (!%p787_p6), %v625_v47, %v624_v46  ;;  %v627_v51 = vld [vmem:[%s1178_s2 + $0x18] sm:$0xff] (!%p787_p6)  ;;  %v788_v55 = vld [vmem:[%s1178_s2 + $0x20] ss:$0 sm:$0xff] (!%p787_p6) }
  0x1c   : > { %v922_v53 = vpack.c.bf16 (!%p787_p6), %v627_v51, %v626_v48 }
  0x1d   : > { %830 = vmatmul.mubr.msk.f32.vlgmr.msra.gmra.mrb[0].mxu0 %vm208_vm1, %v201_v12 }
  0x1e   : > { %899 = vmatpush3.bf16.msra.mxu1 %v898_v13  ;;  %902 = vmatpush3.bf16.msra.mxu0 %v895_v8 }
  0x1f   : > { %903 = vmatprep.subr.bf16.mxu0 %v1025_v5  ;;  %906 = vmatprep.subr.bf16.mxu1 %v1025_v5 }
  0x20   : > { %832 = vmatprep.mubr.msk.f32.mxu0 %vm208_vm1, %v202_v15 }
  0x21   : > { %844 = vmatmul.mubr.msk.f32.vlgmr.msra.gmra.mrb[0].mxu1 %vm306_vm3, %v311_v14  ;;  %833 = vmatmul.mubr.msk.f32.gmra.mrb[2].mxu0 %vm208_vm1, %v203_v16 }
  0x22   : > { %905 = vmatpush3.bf16.msra.mxu0 %v898_v13  ;;  %908 = vmatpush3.bf16.msra.mxu1 %v895_v8 }
  0x23   : > { %909 = vmatprep.subr.bf16.mxu1 %v1025_v5  ;;  %865 = vmatprep.mubr.msk.f32.mxu1 %vm1026_vm2, %v1027_v11 }
  0x24   : > { %912 = vmatprep.subr.bf16.mxu0 %v1025_v5  ;;  %854 = vmatprep.mubr.msk.f32.mxu0 %vm1026_vm2, %v1027_v11 }
  0x26   : > { %911 = vmatpush3.bf16.msra.mxu1 %v898_v13 }
  0xf0   : > { %v831_v18 = vpop.f32.mrb[0].mxu0 }
  0xf1   : > { %v293_v19 = vadd.f32 %v831_v18, %v778_v17  ;;  %v287_v20 = vpop.f32.mrb[1].mxu0 }
  0xf2   : > { %v288_v21 = vadd.f32 %v778_v17, %v287_v20 }
  0xf3   : > { %308 = vst.msk [vmem:[#allocation2 + $0x8] sm:$0xff] %vm306_vm3, %v293_v19 }
  0xf4   : > { %307 = vst.msk [vmem:[#allocation2] sm:$0xff] %vm306_vm3, %v288_v21  ;;  %v382_v22 = vpop.f32.mrb[0].mxu1  ;;  %v834_v27 = vpop.f32.mrb[2].mxu0 }
  0xf5   : > { %v845_v23 = vpop.f32.mrb[1].mxu1  ;;  %v303_v28 = vadd.f32 %v834_v27, %v778_v17  ;;  %v297_v29 = vpop.f32.mrb[3].mxu0 }
  0xf6   : > { %v298_v30 = vadd.f32 %v778_v17, %v297_v29 }
  0xf7   : > { %310 = vst.msk [vmem:[#allocation2 + $0x18] sm:$0xff] %vm306_vm3, %v303_v28 }
  0xf8   : > { %309 = vst.msk [vmem:[#allocation2 + $0x10] sm:$0xff] %vm306_vm3, %v298_v30 }
  0xfa   : > { %v389_v31 = vld [vmem:[#allocation2 + $0x8] sm:$0xff] }
  0xfb   : > { %v312_v24 = vld [vmem:[#allocation2] sm:$0xff] }
  0xfc   : > { %v386_v25 = vadd.f32 %v382_v22, %v312_v24 }
  0xfe   : > { %962 = vtanh.f32 %v386_v25  ;;  %v543_v41 = vld [vmem:[#allocation2 + $0x18] sm:$0xff] }
  0xff   : > { %v466_v36 = vld [vmem:[#allocation2 + $0x10] sm:$0xff] }
 0x108   : > { %v963_v26 = vpop.eup %962 }
 0x109   : > { %855 = vmatmul.mubr.msk.f32.vlgmr.msra.gmra.mrb[4].mxu0 %vm306_vm3, %v963_v26 }
 0x10a   : > { %914 = vmatpush3.bf16.msra.mxu0 %v895_v8  ;;  %876 = vmatprep.mubr.msk.f32.mxu0 %vm1026_vm2, %v1027_v11 }
 0x10b   : > { %915 = vmatprep.subr.bf16.mxu0 %v1025_v5 }
 0x10e   : > { %917 = vmatpush3.bf16.msra.mxu0 %v898_v13 }
 0x10f   : > { %918 = vmatprep.subr.bf16.mxu0 (!%p787_p6), %v1028_v49 }
 0x1dc   : > { %v459_v32 = vpop.f32.mrb[4].mxu0 }
 0x1dd   : > { %v463_v33 = vadd.f32 %v459_v32, %v389_v31  ;;  %v856_v34 = vpop.f32.mrb[5].mxu0 }
 0x1df   : > { %964 = vtanh.f32 %v463_v33 }
 0x1e9   : > { %v965_v35 = vpop.eup %964 }
 0x1ea   : > { %866 = vmatmul.mubr.msk.f32.vlgmr.msra.gmra.mrb[2].mxu1 %vm306_vm3, %v965_v35 }
 0x2bd   : > { %v536_v37 = vpop.f32.mrb[2].mxu1 }
 0x2be   : > { %v540_v38 = vadd.f32 %v536_v37, %v466_v36  ;;  %v867_v39 = vpop.f32.mrb[3].mxu1 }
 0x2c0   : > { %966 = vtanh.f32 %v540_v38 }
 0x2ca   : > { %v967_v40 = vpop.eup %966 }
 0x2cb   : > { %877 = vmatmul.mubr.msk.f32.vlgmr.msra.gmra.mrb[6].mxu0 %vm306_vm3, %v967_v40 }
 0x2cc   : > { %887 = vmatprep.mubr.msk.f32.mxu0 (!%p787_p6), %vm1029_vm4, %v1030_v52  ;;  %920 = vmatpush3.bf16.msra.mxu0 (!%p787_p6), %v919_v50 }
 0x2cd   : > { %921 = vmatprep.subr.bf16.mxu0 (!%p787_p6), %v1028_v49 }
 0x2d0   : > { %923 = vmatpush3.bf16.msra.mxu0 (!%p787_p6), %v922_v53 }
 0x39e   : > { %v613_v42 = vpop.f32.mrb[6].mxu0 }
 0x39f   : > { %v617_v43 = vadd.f32 %v613_v42, %v543_v41  ;;  %v878_v44 = vpop.f32.mrb[7].mxu0 }
 0x3a1   : > { %968 = vtanh.f32 %v617_v43 }
 0x3a6   : > { %623 = sbr.rel (%p787_p6) target bundleno = 1163 (0x48b), region = 40 }
 0x3ab   : > { %v969_v45 = vpop.eup %968 }
 0x3ac   : > { %619 = vst.msk [vmem:[#allocation3] sm:$0xff] %vm306_vm3, %v969_v45 }
 0x3b3   : > { %v629_v54 = vld [vmem:[#allocation3] sm:$0xff] }
 0x3b4   : > { %888 = vmatmul.mubr.msk.f32.vlgmr.msra.gmra.mrb[0].mxu0 %vm306_vm3, %v629_v54 }
 0x487   : > { %v703_v56 = vpop.f32.mrb[0].mxu0 }
 0x488   : > { %v704_v57 = vadd.f32 %v788_v55, %v703_v56  ;;  %v889_v58 = vpop.f32.mrb[1].mxu0 }
 0x48a   : > { %708 = vst.msk [vmem:[#allocation4] sm:$0xff] %vm707_vm5, %v704_v57 }
 0x48b PF: > { %p1141_p7 = scmp.eq.s32.totalorder %s771_s15, 1  ;;  %s1031_s24 = smov [#allocation4]  }
 0x48c   : > { %s718_s25 = sshll.u32 %s1031_s24, 4  ;;  %s719_s25 = int_to_ptr.vmem [resolvable:$true] %s718_s25 }
 0x48d   : > { %s970_s26 = scalar_lea.vmem %s719_s25, 128  ;;  %p977_p11 = scmp.lt.s32.totalorder %s719_s25, %s719_s25 }
 0x48e   : > { %p971_p8 = scmp.ne.s32.totalorder %s719_s25, %s970_s26  ;;  %p978_p12 = scmp.lt.s32.totalorder %s970_s26, %s970_s26 }
 0x490   : > { %p972_p9 = pnand %p971_p8, %p1141_p7  ;;  %p979_p13 = por %p978_p12, %p977_p11 }
 0x492   : > { %p973_p10 = pneg %p972_p9 }
 0x494   : > { %p980_p0 = pnand %p979_p13, %p973_p10 }
 0x496   : > { %983 = shalt.err (!%p980_p0)
}
 0x497   : > { %s984_s15 = scalar_lea.hbm %s1179_s3, 128 }
 0x498   : > { %p985_p1 = scmp.ne.s32.totalorder %s1179_s3, %s984_s15  ;;  %p990_p4 = scmp.lt.u32.totalorder %s984_s15, %s1179_s3 }
 0x49a   : > { %p986_p2 = pnand %p985_p1, %p1141_p7 }
 0x49c   : > { %p987_p3 = pneg %p986_p2 }
 0x49e   : > { %p992_p5 = pnand %p990_p4, %p987_p3 }
 0x4a0   : > { %995 = shalt.err (!%p992_p5)
}
 0x4a1   : > { %925 = dma.vmem_to_hbm [thread:$0]  (%p1141_p7), %s719_s25, 128, %s1179_s3, [#allocation5]  }
 0x4a2   : > { %1009 = dma.done.wait (%p1141_p7), [#allocation5], 128  }
 0x4a3   : > { %1011 = vsyncadd (%p1141_p7), [#allocation5], 4294967168 }
 0x4a4 PF: > { %s14_s14 = sadd.s32 1, %s1022_s14   ;;  %s1181_s12 = smov %s1018_s13 }
 0x4a5   : > { %p11_p6 = scmp.ge.s32.totalorder %s14_s14, 4   ;;  %s1182_s13 = smov %s1184_s16 }
 0x4a7   :  { %13 = sbr.rel (!%p11_p6) target bundleno = 2 (0x2), region = 71 }
 0x4ae   :  { %731 = vsyncpa [#allocation5], 1 }
 0x4af   :  { %733 = vsyncpa [#allocation5 + $0x1], 1 }

</bundles_post_ra>
